<compile_context>
chip_gen: v6e
topology: v6e:2x2x1
jax: 0.10.0
libtpu: 0.0.40
codegen_flags: <defaults>
</compile_context>

<pallas_src>
import functools

import jax
import jax.numpy as jnp
from jax import lax
from jax.experimental import pallas as pl
from jax.experimental.pallas import tpu as pltpu

_LANES = 128
_SUBLANES = 8
_NCORES = 2              # leading "parallel" grid axis; uses both TCs on v7x
_MAX_BLOCK_ROWS = 2048   # (2048, 128) f32 = 1 MiB per input block


def _round_up(x, m):
    return ((x + m - 1) // m) * m


def _dice_bce_kernel(x_ref, t_ref, out_ref, *, n_valid, block_rows, steps):
    """Accumulate lane-level partial sums for one (block_rows, 128) tile.

    out_ref block (4, 8, 128) f32 stays resident across the reduction axis:
      [0] sum of per-element BCE-with-logits
      [1] sum of sigmoid(x) * t   (intersection)
      [2] sum of sigmoid(x)
      [3] sum of t
    """
    core = pl.program_id(0)
    step = pl.program_id(1)

    @pl.when(step == 0)
    def _init():
        out_ref[...] = jnp.zeros_like(out_ref)

    # Exact validity mask from the *logical* (unclamped) block index: garbage
    # rows of partial edge blocks and the duplicated (clamped) last block both
    # contribute exactly zero.  (int32 indexing: supports < 2^31 elements.)
    logical_block = core * steps + step
    base = logical_block * (block_rows * _LANES)
    row_ids = lax.broadcasted_iota(jnp.int32, (block_rows, _LANES), 0)
    col_ids = lax.broadcasted_iota(jnp.int32, (block_rows, _LANES), 1)
    mask = (base + row_ids * _LANES + col_ids) < n_valid

    x = x_ref[...].astype(jnp.float32)
    t = t_ref[...].astype(jnp.float32)
    t = jnp.where(mask, t, 0.0)

    # Shared transcendental: e = exp(-|x|).
    e = jnp.exp(-jnp.abs(x))
    # Numerically stable BCE-with-logits (PyTorch formulation):
    #   max(x, 0) - x*t + log(1 + exp(-|x|))
    bce = jnp.maximum(x, 0.0) - x * t + jnp.log1p(e)
    # sigmoid(x) = where(x >= 0, 1, e) / (1 + e) -- reuses e, approx rcp on EUP.
    p = jnp.where(x >= 0.0, 1.0, e) * pl.reciprocal(1.0 + e, approx=True)

    # Zero out invalid lanes (select, so NaN/Inf garbage never propagates).
    bce = jnp.where(mask, bce, 0.0)
    p = jnp.where(mask, p, 0.0)

    def lane_sum(v):
        # (block_rows, 128) -> (8, 128): vreg-aligned split of the sublane
        # axis; pure VPU vreg adds, no cross-lane (XLU) work in the hot loop.
        return v.reshape(-1, _SUBLANES, _LANES).sum(axis=0)

    out_ref[0] += lane_sum(bce)
    out_ref[1] += lane_sum(p * t)
    out_ref[2] += lane_sum(p)
    out_ref[3] += lane_sum(t)


def dice_bce_loss(inputs, targets, smooth=1.0):
    """Pallas TPU implementation of DiceBCELoss.forward.

    inputs: logits, any shape (e.g. NCHW), any float dtype.
    targets: same shape, values in {0, 1}.
    Returns scalar float32: BCEWithLogitsLoss (mean) + soft-Dice loss.
    """
    x = jnp.ravel(inputs)
    t = jnp.ravel(targets)
    n = x.shape[0]

    # Pad only to the next lane multiple (and at least one (8,128) tile) so the
    # 2-D reshape is legal.  Padded elements are masked exactly in the kernel,
    # so the pad value is irrelevant; for lane-aligned inputs (common case)
    # this is a no-op and no extra HBM copy is made.
    n_pad = max(_round_up(n, _LANES), _SUBLANES * _LANES)
    if n_pad != n:
        x = jnp.pad(x, (0, n_pad - n))
        t = jnp.pad(t, (0, n_pad - n))
    rows = n_pad // _LANES

    # block_rows is a multiple of 8 and never exceeds `rows` (rows >= 8).
    block_rows = min(_MAX_BLOCK_ROWS, _round_up(pl.cdiv(rows, _NCORES), _SUBLANES))
    total_blocks = pl.cdiv(rows, block_rows)
    steps = pl.cdiv(total_blocks, _NCORES)

    x2 = x.reshape(rows, _LANES)
    t2 = t.reshape(rows, _LANES)

    def in_map(c, i):
        # Clamp so the DMA window never starts past the array; the kernel's
        # logical-offset mask zeroes any duplicated block's contribution.
        return (jnp.minimum(c * steps + i, total_blocks - 1), 0)

    in_spec = pl.BlockSpec((block_rows, _LANES), in_map)

    kernel = functools.partial(
        _dice_bce_kernel, n_valid=n, block_rows=block_rows, steps=steps)

    partials = pl.pallas_call(
        kernel,
        out_shape=jax.ShapeDtypeStruct((_NCORES * 4, _SUBLANES, _LANES), jnp.float32),
        grid_spec=pltpu.PrefetchScalarGridSpec(
            num_scalar_prefetch=0,
            grid=(_NCORES, steps),
            in_specs=[in_spec, in_spec],
            out_specs=pl.BlockSpec((4, _SUBLANES, _LANES), lambda c, i: (c, 0, 0)),
        ),
        compiler_params=pltpu.CompilerParams(
            dimension_semantics=("parallel", "arbitrary"),
        ),
    )(x2, t2)

    # Final cross-lane reductions + loss formula in plain JAX (tiny).
    sums = partials.reshape(_NCORES, 4, _SUBLANES, _LANES).sum(axis=(0, 2, 3))
    bce_mean = sums[0] / jnp.float32(n)
    dice_loss = 1.0 - (2.0 * sums[1] + smooth) / (sums[2] + sums[3] + smooth)
    return bce_mean + dice_loss


def _reference_dice_bce(inputs, targets, smooth=1.0):
    x = jnp.ravel(inputs).astype(jnp.float32)
    t = jnp.ravel(targets).astype(jnp.float32)
    bce = jnp.mean(jnp.maximum(x, 0.0) - x * t + jnp.log1p(jnp.exp(-jnp.abs(x))))
    p = jax.nn.sigmoid(x)
    inter = jnp.sum(p * t)
    dice = 1.0 - (2.0 * inter + smooth) / (jnp.sum(p) + jnp.sum(t) + smooth)
    return bce + dice


if __name__ == "__main__":
    key = jax.random.PRNGKey(0)
    k1, k2 = jax.random.split(key)
    # NCHW logits and binary targets, small shapes.
    inputs = jax.random.normal(k1, (2, 4, 16, 16), dtype=jnp.float32)
    targets = (jax.random.uniform(k2, (2, 4, 16, 16)) > 0.5).astype(jnp.float32)

    loss = dice_bce_loss(inputs, targets, smooth=1.0)
    loss = jax.block_until_ready(loss)

    ref = _reference_dice_bce(inputs, targets, smooth=1.0)
    # approx-reciprocal sigmoid -> allow ~1e-3 slack on an O(1) loss value.
    assert jnp.allclose(loss, ref, atol=2e-3, rtol=2e-3), (loss, ref)

    print("KERNEL_OK")
</pallas_src>

<mosaic_0001>
module attributes {stable_mosaic.version = 11 : i64} {
  func.func @_dice_bce_kernel(%arg0: i32, %arg1: i32, %arg2: memref<8x128xf32, #tpu.memory_space<vmem>>, %arg3: memref<8x128xf32, #tpu.memory_space<vmem>>, %arg4: memref<4x8x128xf32, #tpu.memory_space<vmem>>) attributes {dimension_semantics = [#tpu.dimension_semantics<parallel>, #tpu.dimension_semantics<arbitrary>], iteration_bounds = array<i64: 2, 1>, scalar_prefetch = 0 : i64, scratch_operands = 0 : i64, tpu.core_type = #tpu.core_type<tc>, window_params = [{transform_indices = @transform_0, window_bounds = array<i64: 8, 128>}, {transform_indices = @transform_1, window_bounds = array<i64: 8, 128>}, {transform_indices = @transform_2, window_bounds = array<i64: 4, 8, 128>}]} {
    %c0_i32 = arith.constant 0 : i32
    %0 = arith.cmpi eq, %arg1, %c0_i32 : i32
    %1 = arith.extui %0 : i1 to i32
    %c0_i32_0 = arith.constant 0 : i32
    %2 = arith.cmpi ne, %1, %c0_i32_0 : i32
    scf.if %2 {
      %cst_36 = arith.constant 0.000000e+00 : f32
      %74 = vector.broadcast %cst_36 : f32 to vector<4x8x128xf32>
      %c0_37 = arith.constant 0 : index
      %c0_38 = arith.constant 0 : index
      %c0_39 = arith.constant 0 : index
      %75 = vector.load %arg4[%c0_37, %c0_38, %c0_39] : memref<4x8x128xf32, #tpu.memory_space<vmem>>, vector<4x8x128xf32>
      tpu.vector_store %arg4[%c0_37, %c0_38, %c0_39], %74 {strides = array<i32>} : memref<4x8x128xf32, #tpu.memory_space<vmem>>, vector<4x8x128xf32>,
    } else {
    }
    %c1_i32 = arith.constant 1 : i32
    %3 = arith.muli %arg0, %c1_i32 : i32
    %4 = arith.addi %3, %arg1 : i32
    %c1024_i32 = arith.constant 1024 : i32
    %5 = arith.muli %4, %c1024_i32 : i32
    %6 = tpu.iota {dimensions = array<i32: 0>} : vector<8x128xi32>
    %7 = tpu.iota {dimensions = array<i32: 1>} : vector<8x128xi32>
    %c128_i32 = arith.constant 128 : i32
    %8 = vector.broadcast %c128_i32 : i32 to vector<8x128xi32>
    %9 = arith.muli %6, %8 : vector<8x128xi32>
    %10 = vector.broadcast %5 : i32 to vector<8x128xi32>
    %11 = arith.addi %10, %9 : vector<8x128xi32>
    %12 = arith.addi %11, %7 : vector<8x128xi32>
    %c2048_i32 = arith.constant 2048 : i32
    %13 = vector.broadcast %c2048_i32 : i32 to vector<8x128xi32>
    %14 = arith.cmpi slt, %12, %13 : vector<8x128xi32>
    %c0 = arith.constant 0 : index
    %c0_1 = arith.constant 0 : index
    %15 = vector.load %arg2[%c0, %c0_1] : memref<8x128xf32, #tpu.memory_space<vmem>>, vector<8x128xf32>
    %c0_2 = arith.constant 0 : index
    %c0_3 = arith.constant 0 : index
    %16 = vector.load %arg3[%c0_2, %c0_3] : memref<8x128xf32, #tpu.memory_space<vmem>>, vector<8x128xf32>
    %cst = arith.constant 0.000000e+00 : f32
    %17 = vector.broadcast %cst : f32 to vector<8x128xf32>
    %18 = arith.select %14, %16, %17 : vector<8x128xi1>, vector<8x128xf32>
    %19 = math.absf %15 : vector<8x128xf32>
    %cst_4 = arith.constant 0.000000e+00 : f32
    %20 = vector.broadcast %cst_4 : f32 to vector<8x128xf32>
    %21 = arith.subf %20, %19 : vector<8x128xf32>
    %22 = math.exp %21 : vector<8x128xf32>
    %cst_5 = arith.constant 0.000000e+00 : f32
    %23 = vector.broadcast %cst_5 : f32 to vector<8x128xf32>
    %24 = arith.maximumf %15, %23 : vector<8x128xf32>
    %25 = arith.mulf %15, %18 : vector<8x128xf32>
    %26 = arith.subf %24, %25 : vector<8x128xf32>
    %27 = math.log1p %22 : vector<8x128xf32>
    %28 = arith.addf %26, %27 : vector<8x128xf32>
    %cst_6 = arith.constant 0.000000e+00 : f32
    %29 = vector.broadcast %cst_6 : f32 to vector<8x128xf32>
    %30 = arith.cmpf oge, %15, %29 : vector<8x128xf32>
    %cst_7 = arith.constant 1.000000e+00 : f32
    %31 = vector.broadcast %cst_7 : f32 to vector<8x128xf32>
    %32 = arith.select %30, %31, %22 : vector<8x128xi1>, vector<8x128xf32>
    %cst_8 = arith.constant 1.000000e+00 : f32
    %33 = vector.broadcast %cst_8 : f32 to vector<8x128xf32>
    %34 = arith.addf %33, %22 : vector<8x128xf32>
    %35 = tpu.reciprocal %34 {approx = true} : vector<8x128xf32> -> vector<8x128xf32>
    %36 = arith.mulf %32, %35 : vector<8x128xf32>
    %cst_9 = arith.constant 0.000000e+00 : f32
    %37 = vector.broadcast %cst_9 : f32 to vector<8x128xf32>
    %38 = arith.select %14, %28, %37 : vector<8x128xi1>, vector<8x128xf32>
    %cst_10 = arith.constant 0.000000e+00 : f32
    %39 = vector.broadcast %cst_10 : f32 to vector<8x128xf32>
    %40 = arith.select %14, %36, %39 : vector<8x128xi1>, vector<8x128xf32>
    %c0_11 = arith.constant 0 : index
    %c0_12 = arith.constant 0 : index
    %c0_13 = arith.constant 0 : index
    %41 = vector.load %arg4[%c0_11, %c0_12, %c0_13] : memref<4x8x128xf32, #tpu.memory_space<vmem>>, vector<1x8x128xf32>
    %42 = vector.shape_cast %41 : vector<1x8x128xf32> to vector<8x128xf32>
    %43 = vector.shape_cast %38 : vector<8x128xf32> to vector<1x8x128xf32>
    %cst_14 = arith.constant dense<0.000000e+00> : vector<8x128xf32>
    %44 = vector.multi_reduction <add>, %43, %cst_14 [0] : vector<1x8x128xf32> to vector<8x128xf32>
    %45 = arith.addf %42, %44 : vector<8x128xf32>
    %c0_15 = arith.constant 0 : index
    %c0_16 = arith.constant 0 : index
    %c0_17 = arith.constant 0 : index
    %46 = vector.load %arg4[%c0_15, %c0_16, %c0_17] : memref<4x8x128xf32, #tpu.memory_space<vmem>>, vector<1x8x128xf32>
    %47 = vector.shape_cast %46 : vector<1x8x128xf32> to vector<8x128xf32>
    %48 = vector.shape_cast %45 : vector<8x128xf32> to vector<1x8x128xf32>
    tpu.vector_store %arg4[%c0_15, %c0_16, %c0_17], %48 {strides = array<i32>} : memref<4x8x128xf32, #tpu.memory_space<vmem>>, vector<1x8x128xf32>,
    %c1 = arith.constant 1 : index
    %c0_18 = arith.constant 0 : index
    %c0_19 = arith.constant 0 : index
    %49 = vector.load %arg4[%c1, %c0_18, %c0_19] : memref<4x8x128xf32, #tpu.memory_space<vmem>>, vector<1x8x128xf32>
    %50 = vector.shape_cast %49 : vector<1x8x128xf32> to vector<8x128xf32>
    %51 = arith.mulf %40, %18 : vector<8x128xf32>
    %52 = vector.shape_cast %51 : vector<8x128xf32> to vector<1x8x128xf32>
    %cst_20 = arith.constant dense<0.000000e+00> : vector<8x128xf32>
    %53 = vector.multi_reduction <add>, %52, %cst_20 [0] : vector<1x8x128xf32> to vector<8x128xf32>
    %54 = arith.addf %50, %53 : vector<8x128xf32>
    %c1_21 = arith.constant 1 : index
    %c0_22 = arith.constant 0 : index
    %c0_23 = arith.constant 0 : index
    %55 = vector.load %arg4[%c1_21, %c0_22, %c0_23] : memref<4x8x128xf32, #tpu.memory_space<vmem>>, vector<1x8x128xf32>
    %56 = vector.shape_cast %55 : vector<1x8x128xf32> to vector<8x128xf32>
    %57 = vector.shape_cast %54 : vector<8x128xf32> to vector<1x8x128xf32>
    tpu.vector_store %arg4[%c1_21, %c0_22, %c0_23], %57 {strides = array<i32>} : memref<4x8x128xf32, #tpu.memory_space<vmem>>, vector<1x8x128xf32>,
    %c2 = arith.constant 2 : index
    %c0_24 = arith.constant 0 : index
    %c0_25 = arith.constant 0 : index
    %58 = vector.load %arg4[%c2, %c0_24, %c0_25] : memref<4x8x128xf32, #tpu.memory_space<vmem>>, vector<1x8x128xf32>
    %59 = vector.shape_cast %58 : vector<1x8x128xf32> to vector<8x128xf32>
    %60 = vector.shape_cast %40 : vector<8x128xf32> to vector<1x8x128xf32>
    %cst_26 = arith.constant dense<0.000000e+00> : vector<8x128xf32>
    %61 = vector.multi_reduction <add>, %60, %cst_26 [0] : vector<1x8x128xf32> to vector<8x128xf32>
    %62 = arith.addf %59, %61 : vector<8x128xf32>
    %c2_27 = arith.constant 2 : index
    %c0_28 = arith.constant 0 : index
    %c0_29 = arith.constant 0 : index
    %63 = vector.load %arg4[%c2_27, %c0_28, %c0_29] : memref<4x8x128xf32, #tpu.memory_space<vmem>>, vector<1x8x128xf32>
    %64 = vector.shape_cast %63 : vector<1x8x128xf32> to vector<8x128xf32>
    %65 = vector.shape_cast %62 : vector<8x128xf32> to vector<1x8x128xf32>
    tpu.vector_store %arg4[%c2_27, %c0_28, %c0_29], %65 {strides = array<i32>} : memref<4x8x128xf32, #tpu.memory_space<vmem>>, vector<1x8x128xf32>,
    %c3 = arith.constant 3 : index
    %c0_30 = arith.constant 0 : index
    %c0_31 = arith.constant 0 : index
    %66 = vector.load %arg4[%c3, %c0_30, %c0_31] : memref<4x8x128xf32, #tpu.memory_space<vmem>>, vector<1x8x128xf32>
    %67 = vector.shape_cast %66 : vector<1x8x128xf32> to vector<8x128xf32>
    %68 = vector.shape_cast %18 : vector<8x128xf32> to vector<1x8x128xf32>
    %cst_32 = arith.constant dense<0.000000e+00> : vector<8x128xf32>
    %69 = vector.multi_reduction <add>, %68, %cst_32 [0] : vector<1x8x128xf32> to vector<8x128xf32>
    %70 = arith.addf %67, %69 : vector<8x128xf32>
    %c3_33 = arith.constant 3 : index
    %c0_34 = arith.constant 0 : index
    %c0_35 = arith.constant 0 : index
    %71 = vector.load %arg4[%c3_33, %c0_34, %c0_35] : memref<4x8x128xf32, #tpu.memory_space<vmem>>, vector<1x8x128xf32>
    %72 = vector.shape_cast %71 : vector<1x8x128xf32> to vector<8x128xf32>
    %73 = vector.shape_cast %70 : vector<8x128xf32> to vector<1x8x128xf32>
    tpu.vector_store %arg4[%c3_33, %c0_34, %c0_35], %73 {strides = array<i32>} : memref<4x8x128xf32, #tpu.memory_space<vmem>>, vector<1x8x128xf32>,
    return
  }
  func.func @transform_0(%arg0: i32, %arg1: i32) -> (i32, i32) {
    %c1_i32 = arith.constant 1 : i32
    %0 = arith.muli %arg0, %c1_i32 : i32
    %1 = arith.addi %0, %arg1 : i32
    %c1_i32_0 = arith.constant 1 : i32
    %2 = arith.minsi %1, %c1_i32_0 : i32
    %c0_i32 = arith.constant 0 : i32
    %c0_i32_1 = arith.constant 0 : i32
    return %2, %c0_i32 : i32, i32
  }
  func.func @transform_1(%arg0: i32, %arg1: i32) -> (i32, i32) {
    %c1_i32 = arith.constant 1 : i32
    %0 = arith.muli %arg0, %c1_i32 : i32
    %1 = arith.addi %0, %arg1 : i32
    %c1_i32_0 = arith.constant 1 : i32
    %2 = arith.minsi %1, %c1_i32_0 : i32
    %c0_i32 = arith.constant 0 : i32
    %c0_i32_1 = arith.constant 0 : i32
    return %2, %c0_i32 : i32, i32
  }
  func.func @transform_2(%arg0: i32, %arg1: i32) -> (i32, i32, i32) {
    %c0_i32 = arith.constant 0 : i32
    %c0_i32_0 = arith.constant 0 : i32
    %c0_i32_1 = arith.constant 0 : i32
    return %arg0, %c0_i32, %c0_i32_0 : i32, i32, i32
  }
}

</mosaic_0001>

<bundles_post_ra>
// kernel: tpu_custom_call.1
= control target key start
LH: loop header
LB: loop body
LE: loop exit
PB: predicated region body
PF: predicated region fallthrough
CT: control target
= control target key end

     0   :  { %s950_s0 = inlined_call_operand.hbm [shape: f32[16,128], index: 0, kind: input, shape index: {}]   ;;  %s951_s1 = inlined_call_operand.hbm [shape: f32[16,128], index: 1, kind: input, shape index: {}]   ;;  %s952_s2 = inlined_call_operand.hbm [shape: f32[8,8,128], index: 2, kind: output, shape index: {}]  }
   0x1   :  { %953 = sst [smem:[#allocation11_spill]] %s950_s0 }
   0x2   :  { %7 = vsyncpa [#allocation3], 0 }
   0x3   :  { %9 = vsyncpa [#allocation3 + $0x1], 0 }
   0x4   :  { %10 = vsyncpa [#allocation6], 0 }
   0x5   :  { %12 = vsyncpa [#allocation6 + $0x1], 0 }
   0x6   :  { %13 = vsyncpa [#allocation4], 0 }
   0x7   :  { %15 = vsyncpa [#allocation4 + $0x1], 0  ;;  %s728_s9 = smov 0   ;;  %s730_s10 = smov 0  }
   0x8   :  { %s732_s11 = smov 0   ;;  %s734_s12 = smov 0  }
   0x9   :  { %s736_s13 = smov 0   ;;  %s738_s14 = smov 0  }
   0xa   :  { %s740_s15 = smov 0   ;;  %s742_s16 = smov 0  }
   0xb   :  { %s744_s17 = smov 0  }
   0xc LB: > { %s417_s18 = sadd.s32 4294967295, %s706_s17   ;;  %s418_s19 = sadd.s32 4294967294, %s706_s17   ;;  %s706_s17 = sphi %s744_s17, %s21_s17   ;;  %s702_s16 = sphi %s742_s16, %s969_s16   ;;  %s698_s15 = sphi %s740_s15, %s968_s15   ;;  %s694_s14 = sphi %s738_s14, %s967_s14   ;;  %s690_s13 = sphi %s736_s13, %s966_s13   ;;  %s686_s12 = sphi %s734_s12, %s965_s12   ;;  %s682_s11 = sphi %s732_s11, %s964_s11   ;;  %s678_s10 = sphi %s730_s10, %s963_s10   ;;  %s674_s9 = sphi %s728_s9, %s962_s9  }
   0xd   : > { %s33_s20 = sadd.s32 1, %s702_s16  ;;  %p38_p0 = scmp.lt.s32.totalorder %s702_s16, 1 }
   0xe   : > { %p35_p1 = scmp.ge.s32.totalorder %s33_s20, 2  ;;  %s46_s21 = sadd.s32 1, %s694_s14 }
   0xf   : > { %s777_s22 = scalar_select %p38_p0, %s702_s16, 1 }
  0x10   : > { %s971_s20 = smov (%p35_p1, %s33_s20), 0  ;;  %p53_p2 = scmp.ne.s32.totalorder %s694_s14, %s690_s13 }
  0x11   : > { %p54_p3 = scmp.eq.s32.totalorder %s706_s17, 0  ;;  %p41_p4 = scmp.lt.s32.totalorder %s971_s20, 1 }
  0x12   : > { %p59_p5 = scmp.ne.s32.totalorder %s690_s13, %s686_s12  ;;  %p60_p7 = scmp.eq.s32.totalorder %s417_s18, 0 }
  0x13   : > { %p786_p6 = por %p54_p3, %p53_p2  ;;  %s101_s26 = ssub.s32 %s702_s16, %s971_s20 }
  0x14   : > { %s42_s24 = scalar_select %p41_p4, %s971_s20, 1 }
  0x15   : > { %p791_p8 = por %p60_p7, %p59_p5  ;;  %p102_p9 = scmp.eq.s32.totalorder %s101_s26, 0 }
  0x16   : > { %s43_s27 = ssub.s32 %s777_s22, %s42_s24  ;;  %s104_s28 = sadd.s32 1, %s682_s11 }
  0x17   : > { %p44_p10 = scmp.eq.s32.totalorder %s43_s27, 0  ;;  %p114_p11 = scmp.ne.s32.totalorder %s682_s11, %s678_s10 }
  0x18   : > { %s800_s29 = scalar_select %p102_p9, %s682_s11, %s104_s28  }
  0x19   : > { %s803_s30 = scalar_select %p44_p10, %s694_s14, %s46_s21  }
  0x1a   : > { %p115_p12 = scmp.eq.s32.totalorder %s417_s18, 1  ;;  %p120_p13 = scmp.ne.s32.totalorder %s678_s10, %s674_s9 }
  0x1b   : > { %p121_p0 = scmp.eq.s32.totalorder %s418_s19, 1  ;;  %p459_p4 = scmp.lt.s32.totalorder %s706_s17, 2 }
  0x1c   : > { %p809_p1 = por %p115_p12, %p114_p11  ;;  %s820_s5 = sand.u32 1, %s694_s14  }
  0x1d   : > { %p814_p3 = por %p121_p0, %p120_p13  ;;  %s422_s6 = sshll.u32 %s777_s22, 7 }
  0x1e   : > { %s421_s7 = sshll.u32 %s820_s5, 3  ;;  %s958_s0 = sld [smem:[#allocation11_spill]] }
  0x1f   : > { %s145_s19 = scalar_lea.vmem [#allocation2], %s421_s7  ;;  %p829_p5 = pnand %p459_p4, %p786_p6 }
  0x20   : > { %s155_s21 = sshll.u32 %s145_s19, 4  ;;  %p425_p7 = scmp.ge.s32.totalorder %s706_s17, 1  ;;  %s156_s21 = int_to_ptr.vmem [resolvable:$true] %s155_s21 }
  0x21   : > { %p181_p9 = scmp.lt.s32.totalorder %s706_s17, 3  ;;  %s142_s26 = scalar_lea.sflag [#allocation3], %s820_s5 }
  0x22   : > { %p544_p10 = pneg %p829_p5  ;;  %s555_s22 = scalar_lea.vmem %s156_s21, 128 }
  0x23   : > { %p556_p11 = scmp.ne.s32.totalorder %s156_s21, %s555_s22  ;;  %s708_s27 = smov [#allocation2]  }
  0x24   : > { %s153_s18 = scalar_lea.hbm %s958_s0, %s422_s6  ;;  %s560_s23 = sshll.u32 %s708_s27, 4  ;;  %s561_s23 = int_to_ptr.vmem [resolvable:$false] %s560_s23 }
  0x25   : > { %p558_p12 = pnand %p556_p11, %p544_p10  ;;  %s562_s28 = scalar_lea.vmem %s561_s23, 256 }
  0x26   : > { %p563_p6 = scmp.lt.s32.totalorder %s156_s21, %s561_s23  ;;  %p564_p0 = scmp.lt.s32.totalorder %s562_s28, %s555_s22 }
  0x27   : > { %p559_p13 = pneg %p558_p12 }
  0x28   : > { %p565_p4 = por %p564_p0, %p563_p6 }
  0x2a   : > { %p566_p2 = pnand %p565_p4, %p559_p13 }
  0x2c   : > { %569 = shalt.err (!%p566_p2)
}
  0x2d   : > { %451 = dma.hbm_to_vmem [thread:$0]  (!%p829_p5), %s153_s18, 128, %s156_s21, %s142_s26  }
  0x2e   : > { %p847_p11 = pnand %p425_p7, %p181_p9  ;;  %s174_s22 = scalar_lea.hbm %s951_s1, %s422_s6 }
  0x2f   : > { %s166_s27 = scalar_lea.vmem [#allocation5], %s421_s7  ;;  %s163_s28 = scalar_lea.sflag [#allocation6], %s820_s5 }
  0x30   : > { %s176_s23 = sshll.u32 %s166_s27, 4  ;;  %s709_s18 = smov [#allocation5]   ;;  %s177_s23 = int_to_ptr.vmem [resolvable:$true] %s176_s23 }
  0x31   : > { %s583_s0 = scalar_lea.vmem %s177_s23, 128  ;;  %s588_s21 = sshll.u32 %s709_s18, 4  ;;  %s589_s21 = int_to_ptr.vmem [resolvable:$false] %s588_s21 }
  0x32   : > { %p584_p2 = scmp.ne.s32.totalorder %s177_s23, %s583_s0  ;;  %s590_s26 = scalar_lea.vmem %s589_s21, 256 }
  0x33   : > { %p591_p7 = scmp.lt.s32.totalorder %s177_s23, %s589_s21  ;;  %p592_p9 = scmp.lt.s32.totalorder %s590_s26, %s583_s0 }
  0x34   : > { %p586_p12 = pnand %p584_p2, %p544_p10 }
  0x35   : > { %p593_p6 = por %p592_p9, %p591_p7 }
  0x36   : > { %p587_p13 = pneg %p586_p12 }
  0x38   : > { %p594_p0 = pnand %p593_p6, %p587_p13 }
  0x3a   : > { %597 = shalt.err (!%p594_p0)
}
  0x3b   : > { %454 = dma.hbm_to_vmem [thread:$0]  (!%p829_p5), %s174_s22, 128, %s177_s23, %s163_s28  }
  0x3c   : > { %185 = sbr.rel (%p847_p11) target bundleno = 125 (0x7d), region = 28  ;;  %s187_s5 = sand.u32 (!%p847_p11), 1, %s690_s13  }
  0x3d   : > { %s426_s6 = sshll.u32 (!%p847_p11), %s187_s5, 3  ;;  %s188_s7 = scalar_lea.sflag (!%p847_p11), [#allocation3], %s187_s5 }
  0x3e   : > { %s191_s12 = scalar_lea.vmem (!%p847_p11), [#allocation2], %s426_s6 }
  0x41   : > { %661 = dma.done.wait (%p791_p8), %s188_s7, 128  }
  0x42   : > { %663 = vsyncadd (%p791_p8), %s188_s7, 4294967168  ;;  %s197_s0 = scalar_lea.sflag [#allocation6], %s187_s5  ;;  %s200_s19 = scalar_lea.vmem [#allocation5], %s426_s6 }
  0x43   : > { %665 = dma.done.wait (%p791_p8), %s197_s0, 128  }
  0x44   : > { %667 = vsyncadd (%p791_p8), %s197_s0, 4294967168  ;;  %s429_s24 = sshll.u32 %s698_s15, 10  ;;  %v243_v0 = vlaneseq  ;;  %s223_s8 = sand.u32 1, %s678_s10   ;;  %v252_v6 = vld [vmem:[%s191_s12] sm:$0xff]  ;;  %v253_v8 = vld [vmem:[%s200_s19] sm:$0xff] }
  0x45   : > { %v248_v2 = vstv %s429_s24  ;;  %s428_s22 = sshll.u32 %s223_s8, 5  ;;  %v255_v9 = vand.u32 2147483647, %v252_v6  ;;  %v259_v17 = vmax.f32 %v252_v6, 0.0  ;;  %vm272_vm1 = vcmp.ge.f32.partialorder %v252_v6, 0.0  ;;  %s441_s27 = sshll.u32 %s698_s15, 9 }
  0x46   : > { %v244_v1 = vshrl.u32 %v243_v0, 7  ;;  %v246_v3 = vand.u32 127, %v243_v0  ;;  %s876_s25 = scalar_lea.vmem [#allocation7], %s428_s22  ;;  %s886_s21 = scalar_lea.hbm %s952_s2, %s441_s27 }
  0x47   : > { %v256_v10 = vsub.f32 0.0, %v255_v9  ;;  %s313_s23 = sshll.u32 %s876_s25, 4  ;;  %s895_s15 = scalar_lea.sflag [#allocation4], %s223_s8  ;;  %s888_s23 = int_to_ptr.vmem [resolvable:$true] %s313_s23 }
  0x48   : > { %v247_v4 = vmul.u32 128, %v244_v1  ;;  %s598_s26 = scalar_lea.vmem %s888_s23, 512  ;;  %s710_s5 = smov [#allocation7]  }
  0x49   : > { %v257_v12 = vmul.f32 1.442695, %v256_v10  ;;  %p599_p8 = scmp.ne.s32.totalorder %s888_s23, %s598_s26  ;;  %s602_s6 = sshll.u32 %s710_s5, 4  ;;  %s603_s6 = int_to_ptr.vmem [resolvable:$false] %s602_s6 }
  0x4a   : > { %v249_v5 = vadd.s32 %v248_v2, %v247_v4  ;;  %s604_s7 = scalar_lea.vmem %s603_s6, 1024  ;;  %p605_p4 = scmp.lt.s32.totalorder %s888_s23, %s603_s6 }
  0x4b   : > { %536 = vpow2.f32 %v257_v12  ;;  %p600_p5 = pnand %p599_p8, %p809_p1  ;;  %p606_p11 = scmp.lt.s32.totalorder %s604_s7, %s598_s26 }
  0x4c   : > { %v250_v7 = vadd.s32 %v249_v5, %v246_v3 }
  0x4d   : > { %p601_p10 = pneg %p600_p5  ;;  %p607_p2 = por %p606_p11, %p605_p4 }
  0x4e   : > { %vm251_vm0 = vcmp.lt.s32.totalorder %v250_v7, 2048 }
  0x4f   : > { %v254_v11 = vsel %vm251_vm0, %v253_v8, 0.0  ;;  %p608_p12 = pnand %p607_p2, %p601_p10 }
  0x50   : > { %435 = vst [vmem:[%s876_s25 + $0x18] sm:$0xff] %v254_v11  ;;  %v260_v18 = vmul.f32 %v254_v11, %v252_v6 }
  0x52   : > { %v261_v23 = vsub.f32 %v259_v17, %v260_v18 }
  0x58   : > { %v537_v13 = vpop.eup %536 }
  0x59   : > { %v262_v14 = vadd.f32 1.0, %v537_v13  ;;  %v265_v15 = vmul.f32 -0.5, %v537_v13  ;;  %v268_v19 = vand.u32 2147483647, %v537_v13  ;;  %v273_v21 = vsel %vm272_vm1, 1.0, %v537_v13 }
  0x5b   : > { %538 = vlog2.f32 %v262_v14  ;;  %v266_v16 = vadd.f32 1.0, %v265_v15  ;;  %vm269_vm2 = vcmp.lt.f32.partialorder %v268_v19, 0.0004427343 }
  0x5c   : > { %540 = vrcp.f32 %v262_v14 }
  0x5d   : > { %v267_v20 = vmul.f32 %v537_v13, %v266_v16 }
  0x68   : > { %v539_v22 = vpop.eup %538 }
  0x69   : > { %v541_v24 = vpop.eup %540  ;;  %v264_v25 = vmul.f32 0.6931472, %v539_v22 }
  0x6a   : > { %v276_v26 = vmul.f32 %v541_v24, %v273_v21 }
  0x6b   : > { %v270_v27 = vsel %vm269_vm2, %v267_v20, %v264_v25 }
  0x6c   : > { %v271_v28 = vadd.f32 %v270_v27, %v261_v23  ;;  %v278_v29 = vsel %vm251_vm0, %v276_v26, 0.0 }
  0x6d   : > { %v285_v30 = vmul.f32 %v278_v29, %v254_v11  ;;  %433 = vst [vmem:[%s876_s25 + $0x10] sm:$0xff] %v278_v29 }
  0x6e   : > { %v277_v31 = vsel %vm251_vm0, %v271_v28, 0.0 }
  0x6f   : > { %282 = vst [vmem:[%s876_s25] sm:$0xff] %v277_v31  ;;  %431 = vst [vmem:[%s876_s25 + $0x8] sm:$0xff] %v285_v30 }
  0x70   : > { %611 = shalt.err (!%p608_p12)
}
  0x71   : > { %s612_s12 = scalar_lea.hbm %s886_s21, 512  ;;  %s616_s24 = scalar_lea.hbm %s952_s2, 1024 }
  0x72   : > { %p613_p13 = scmp.ne.s32.totalorder %s886_s21, %s612_s12  ;;  %p617_p6 = scmp.lt.s32.totalorder %s886_s21, %s952_s2 }
  0x73   : > { %p618_p0 = scmp.lt.s32.totalorder %s616_s24, %s612_s12 }
  0x74   : > { %p614_p7 = pnand %p613_p13, %p809_p1 }
  0x75   : > { %p619_p8 = por %p618_p0, %p617_p6 }
  0x76   : > { %p615_p9 = pneg %p614_p7 }
  0x78   : > { %p620_p5 = pnand %p619_p8, %p615_p9 }
  0x7a   : > { %623 = shalt.err (!%p620_p5)
}
  0x7b   : > { %s711_s25 = smov 128   ;;  %s712_s27 = smov 8  }
  0x7c   : > { %446 = dma.vmem_to_hbm [thread:$0]  (%p809_p1), %s888_s23, 512, %s886_s21, %s895_s15, %s711_s25, %s711_s25, %s712_s27  }
  0x7d PF: > { %s328_s28 = sand.u32 1, %s674_s9   ;;  %p961_p10 = scmp.ge.s32.totalorder %s706_s17, 2 }
  0x7e   : > { %s329_s18 = scalar_lea.sflag [#allocation4], %s328_s28 }
  0x7f   : > { %p456_p4 = pnand %p961_p10, %p814_p3 }
  0x81   : > { %p457_p11 = pneg %p456_p4 }
  0x83   : > { %669 = dma.done.wait (%p457_p11), %s329_s18, 512  }
  0x84   : > { %671 = vsyncadd (%p457_p11), %s329_s18, 4294966784  ;;  %s21_s17 = sadd.s32 1, %s706_s17   ;;  %s962_s9 = smov %s678_s10 }
  0x85   : > { %p18_p2 = scmp.ge.s32.totalorder %s21_s17, 4   ;;  %s963_s10 = smov %s682_s11 }
  0x86   : > { %s964_s11 = smov %s800_s29  ;;  %s965_s12 = smov %s690_s13 }
  0x87   : > { %s966_s13 = smov %s694_s14  ;;  %s967_s14 = smov %s803_s30 }
  0x88   : > { %s968_s15 = smov %s702_s16  ;;  %s969_s16 = smov %s971_s20 }
  0x89   :  { %20 = sbr.rel (!%p18_p2) target bundleno = 12 (0xc), region = 93 }
  0x8e   :  { %334 = vsyncpa [#allocation3], 1 }
  0x8f   :  { %336 = vsyncpa [#allocation3 + $0x1], 1 }
  0x90   :  { %337 = vsyncpa [#allocation6], 1 }
  0x91   :  { %339 = vsyncpa [#allocation6 + $0x1], 1 }
  0x92   :  { %340 = vsyncpa [#allocation4], 1 }
  0x93   :  { %342 = vsyncpa [#allocation4 + $0x1], 1 }

</bundles_post_ra>
